<compile_context>
chip_gen: v5e
topology: v5e:2x2
jax: 0.10.0
libtpu: 0.0.40
codegen_flags: <defaults>
</compile_context>

<pallas_src>
import functools
import math

import jax
import jax.numpy as jnp
import numpy as np
from jax import lax
from jax.experimental import pallas as pl
from jax.experimental.pallas import tpu as pltpu

NEG_INF = -1e30  # large finite negative mask value (avoids -inf - -inf NaNs)
VMEM_LIMIT_BYTES = 64 * 1024 * 1024


# ---------------------------------------------------------------------------
# Kernel 1: fused QKV projection, M-tiled, per-head output columns.
#   grid = (B, T // tm, head); x block is re-used (DMA-suppressed) across the
#   innermost head axis; outputs land directly in (B, H, T, hd) layout.
#   q's 1/sqrt(hd) scale is pre-folded into wq/bq on the host.
# ---------------------------------------------------------------------------
def _qkv_kernel(x_ref, wq_ref, bq_ref, wk_ref, bk_ref, wv_ref, bv_ref,
                q_ref, k_ref, v_ref):
    x = x_ref[...]                                                    # (tm, C) bf16
    q = jnp.dot(x, wq_ref[...], preferred_element_type=jnp.float32) + bq_ref[...]
    q_ref[...] = q.astype(q_ref.dtype)
    k = jnp.dot(x, wk_ref[...], preferred_element_type=jnp.float32) + bk_ref[...]
    k_ref[...] = k.astype(k_ref.dtype)
    v = jnp.dot(x, wv_ref[...], preferred_element_type=jnp.float32) + bv_ref[...]
    v_ref[...] = v.astype(v_ref.dtype)


def _qkv_proj(x, wq_h, bq_h, wk_h, bk_h, wv_h, bv_h, *, tm):
    B, T, C = x.shape
    H, _, hd = wq_h.shape
    grid = (B, T // tm, H)

    x_spec = pl.BlockSpec((pl.Squeezed(), tm, C), lambda b, i, h: (b, i, 0))
    w_spec = pl.BlockSpec((pl.Squeezed(), C, hd), lambda b, i, h: (h, 0, 0))
    b_spec = pl.BlockSpec((pl.Squeezed(), 1, hd), lambda b, i, h: (h, 0, 0))
    o_spec = pl.BlockSpec((pl.Squeezed(), pl.Squeezed(), tm, hd),
                          lambda b, i, h: (b, h, i, 0))
    out_sh = jax.ShapeDtypeStruct((B, H, T, hd), jnp.bfloat16)

    return pl.pallas_call(
        _qkv_kernel,
        out_shape=(out_sh, out_sh, out_sh),
        grid_spec=pltpu.PrefetchScalarGridSpec(
            num_scalar_prefetch=0,
            grid=grid,
            in_specs=[x_spec, w_spec, b_spec, w_spec, b_spec, w_spec, b_spec],
            out_specs=[o_spec, o_spec, o_spec]),
        compiler_params=pltpu.CompilerParams(
            dimension_semantics=("parallel", "parallel", "arbitrary"),
            vmem_limit_bytes=VMEM_LIMIT_BYTES),
    )(x, wq_h, bq_h, wk_h, bk_h, wv_h, bv_h)


# ---------------------------------------------------------------------------
# Kernel 2: flash attention with the output projection fused in, driven by a
# flattened lower-triangular (qi, head, ki) schedule via scalar prefetch.
#   grid = (B, n_steps); no above-diagonal steps are ever emitted.
#   m/l/acc : per-head online-softmax state (reset at ki==0)
#   oacc    : (tq, C) f32 output-projection accumulator (reset at head==0 & ki==0)
#   wp      : full (H, hd, C) weight held resident in VMEM (constant block index).
# ---------------------------------------------------------------------------
def _flash_proj_kernel(qs_ref, hs_ref, ks_ref,
                       q_ref, k_ref, v_ref, wp_ref, bp_ref, o_ref,
                       m_ref, l_ref, acc_ref, oacc_ref, *, tq, tkv, n_head):
    s_idx = pl.program_id(1)
    qi = qs_ref[s_idx]
    h = hs_ref[s_idx]
    ki = ks_ref[s_idx]
    last_ki = ((qi + 1) * tq - 1) // tkv        # diagonal kv-tile index for this qi

    @pl.when(jnp.logical_and(h == 0, ki == 0))
    def _():
        oacc_ref[...] = jnp.zeros_like(oacc_ref)

    @pl.when(ki == 0)
    def _():
        m_ref[...] = jnp.full_like(m_ref, NEG_INF)
        l_ref[...] = jnp.zeros_like(l_ref)
        acc_ref[...] = jnp.zeros_like(acc_ref)

    # scores: bf16 operands on the MXU, f32 accumulation, contraction = head_dim
    s = lax.dot_general(q_ref[...], k_ref[...], (((1,), (1,)), ((), ())),
                        preferred_element_type=jnp.float32)           # (tq, tkv)

    # causal mask: single iota-difference vs a scalar offset.  On interior
    # (fully-below-diagonal) tiles the predicate is all-true.
    d = (lax.broadcasted_iota(jnp.int32, (tq, tkv), 0)
         - lax.broadcasted_iota(jnp.int32, (tq, tkv), 1))
    s = jnp.where(d >= ki * tkv - qi * tq, s, NEG_INF)

    # online softmax (stats kept in f32).  ki==0 tile always contains column 0,
    # so m never stays at NEG_INF once alpha is used.
    m_prev = m_ref[...]
    m_new = jnp.maximum(m_prev, jnp.max(s, axis=-1, keepdims=True))
    alpha = jnp.exp(m_prev - m_new)
    p = jnp.exp(s - m_new)
    l_ref[...] = alpha * l_ref[...] + jnp.sum(p, axis=-1, keepdims=True)
    acc_ref[...] = alpha * acc_ref[...] + jnp.dot(
        p.astype(v_ref.dtype), v_ref[...], preferred_element_type=jnp.float32)
    m_ref[...] = m_new

    # Finalize this head: normalize once and fold the head output straight into the
    # output projection using the VMEM-resident per-head weight slice.
    @pl.when(ki == last_ki)
    def _():
        y_h = acc_ref[...] * pl.reciprocal(l_ref[...], approx=False)   # (tq, hd) f32
        oacc_ref[...] += jnp.dot(y_h.astype(wp_ref.dtype), wp_ref[h],
                                 preferred_element_type=jnp.float32)   # (tq, C)

    # Last head, diagonal kv tile: add bias and do one lane-dense (tq, C) store.
    @pl.when(jnp.logical_and(h == n_head - 1, ki == last_ki))
    def _():
        o_ref[...] = (oacc_ref[...] + bp_ref[...]).astype(o_ref.dtype)


def _build_causal_schedule(nq, n_head, tq, tkv):
    """Flattened (qi, head, ki) schedule covering only lower-triangular kv tiles."""
    qs, hs, ks = [], [], []
    for qi in range(nq):
        last_ki = ((qi + 1) * tq - 1) // tkv
        for h in range(n_head):
            for ki in range(last_ki + 1):
                qs.append(qi)
                hs.append(h)
                ks.append(ki)
    as_i32 = lambda a: jnp.asarray(np.asarray(a, dtype=np.int32))
    return as_i32(qs), as_i32(hs), as_i32(ks)


def _flash_attention_proj(q, k, v, wp_heads, bp, *, out_dtype, tq, tkv):
    B, H, T, hd = q.shape
    C = H * hd
    nq = T // tq
    qs, hs, ks = _build_causal_schedule(nq, H, tq, tkv)
    n_steps = int(qs.shape[0])
    grid = (B, n_steps)

    q_spec = pl.BlockSpec((pl.Squeezed(), pl.Squeezed(), tq, hd),
                          lambda b, s, q_t, h_t, k_t: (b, h_t[s], q_t[s], 0))
    kv_spec = pl.BlockSpec((pl.Squeezed(), pl.Squeezed(), tkv, hd),
                           lambda b, s, q_t, h_t, k_t: (b, h_t[s], k_t[s], 0))
    # output-projection weight: full array, constant index -> fetched once, resident.
    wp_spec = pl.BlockSpec((H, hd, C), lambda b, s, q_t, h_t, k_t: (0, 0, 0))
    bp_spec = pl.BlockSpec((1, C), lambda b, s, q_t, h_t, k_t: (0, 0))
    o_spec = pl.BlockSpec((pl.Squeezed(), tq, C),
                          lambda b, s, q_t, h_t, k_t: (b, q_t[s], 0))

    return pl.pallas_call(
        functools.partial(_flash_proj_kernel, tq=tq, tkv=tkv, n_head=H),
        out_shape=jax.ShapeDtypeStruct((B, T, C), out_dtype),
        grid_spec=pltpu.PrefetchScalarGridSpec(
            num_scalar_prefetch=3,
            grid=grid,
            in_specs=[q_spec, kv_spec, kv_spec, wp_spec, bp_spec],
            out_specs=o_spec,
            scratch_shapes=[pltpu.VMEM((tq, 1), jnp.float32),    # m
                            pltpu.VMEM((tq, 1), jnp.float32),    # l
                            pltpu.VMEM((tq, hd), jnp.float32),   # per-head acc
                            pltpu.VMEM((tq, C), jnp.float32)]),  # output-proj acc
        compiler_params=pltpu.CompilerParams(
            dimension_semantics=("parallel", "arbitrary"),
            vmem_limit_bytes=VMEM_LIMIT_BYTES),
    )(qs, hs, ks, q, k, v, wp_heads, bp)


# ---------------------------------------------------------------------------
# Top-level wrapper (matches the PyTorch module forward, eval mode).
# ---------------------------------------------------------------------------
def causal_self_attention(x, params, n_head, *, tq=128, tkv=128, tm=256):
    """x: (B, T, C) float32. params: pre-transposed (in,out) weights + (1,out) biases."""
    B, T, C = x.shape
    assert C % n_head == 0
    hd = C // n_head
    scale = 1.0 / math.sqrt(hd)

    # tile sizes (tiny demo shapes -> full extent; bump tq/tkv to 256 on v6e/v7x)
    tq, tkv, tm = min(tq, T), min(tkv, T), min(tm, T)
    assert T % tq == 0 and T % tkv == 0 and T % tm == 0

    xb = x.astype(jnp.bfloat16)

    # Host-side parameter prep (one-time transforms in a real model):
    #   * fold 1/sqrt(hd) into wq/bq (no in-kernel rescale of q or scores)
    #   * per-head layouts: qkv weights (H, C, hd), biases (H, 1, hd), proj (H, hd, C)
    def per_head_w(w):  # (C, C) -> (H, C, hd), bf16
        return w.reshape(C, n_head, hd).transpose(1, 0, 2).astype(jnp.bfloat16)

    def per_head_b(b):  # (1, C) -> (H, 1, hd), f32
        return b.reshape(n_head, hd)[:, None, :].astype(jnp.float32)

    wq_h = per_head_w(params["wq_t"] * scale)
    bq_h = per_head_b(params["bq"] * scale)
    wk_h = per_head_w(params["wk_t"])
    bk_h = per_head_b(params["bk"])
    wv_h = per_head_w(params["wv_t"])
    bv_h = per_head_b(params["bv"])
    wp_heads = params["wp_t"].reshape(n_head, hd, C).astype(jnp.bfloat16)
    bp = params["bp"].astype(jnp.float32)

    # Kernel 1 writes q/k/v directly in (B, H, T, hd) layout -> no split_heads plumbing.
    q, k, v = _qkv_proj(xb, wq_h, bq_h, wk_h, bk_h, wv_h, bv_h, tm=tm)

    return _flash_attention_proj(q, k, v, wp_heads, bp,
                                 out_dtype=x.dtype, tq=tq, tkv=tkv)


# ---------------------------------------------------------------------------
# Pure-JAX reference mirroring the PyTorch forward (eval mode), all float32.
# ---------------------------------------------------------------------------
def _reference(x, params, n_head):
    B, T, C = x.shape
    hd = C // n_head
    q = x @ params["wq_t"] + params["bq"][0]
    k = x @ params["wk_t"] + params["bk"][0]
    v = x @ params["wv_t"] + params["bv"][0]
    q = q.reshape(B, T, n_head, hd).transpose(0, 2, 1, 3)
    k = k.reshape(B, T, n_head, hd).transpose(0, 2, 1, 3)
    v = v.reshape(B, T, n_head, hd).transpose(0, 2, 1, 3)
    att = jnp.einsum("bhqd,bhkd->bhqk", q, k) / math.sqrt(hd)
    mask = jnp.tril(jnp.ones((T, T), dtype=bool))
    att = jnp.where(mask[None, None], att, -jnp.inf)
    att = jax.nn.softmax(att, axis=-1)
    y = jnp.einsum("bhqk,bhkd->bhqd", att, v)
    y = y.transpose(0, 2, 1, 3).reshape(B, T, C)
    return y @ params["wp_t"] + params["bp"][0]


if __name__ == "__main__":
    # Small config: B=2, T=8 (<= max_seqlen), C=n_embd=32, n_head=4
    B, T, C, n_head = 2, 8, 32, 4

    key = jax.random.PRNGKey(0)
    keys = jax.random.split(key, 9)

    def winit(k):
        return jax.random.normal(k, (C, C), jnp.float32) * 0.05

    params = {
        "wq_t": winit(keys[0]), "bq": jax.random.normal(keys[1], (1, C), jnp.float32) * 0.01,
        "wk_t": winit(keys[2]), "bk": jax.random.normal(keys[3], (1, C), jnp.float32) * 0.01,
        "wv_t": winit(keys[4]), "bv": jax.random.normal(keys[5], (1, C), jnp.float32) * 0.01,
        "wp_t": winit(keys[6]), "bp": jax.random.normal(keys[7], (1, C), jnp.float32) * 0.01,
    }

    x = jax.random.normal(keys[8], (B, T, C), jnp.float32)

    out = causal_self_attention(x, params, n_head)
    out = jax.block_until_ready(out)

    ref = _reference(x, params, n_head)
    # bf16 matmul operands + bf16 q/k/v intermediates -> compare vs f32 ref, loose tol
    assert out.shape == ref.shape
    assert jnp.allclose(out, ref, atol=2e-2, rtol=2e-2), "mismatch vs reference"

    print("KERNEL_OK")
</pallas_src>

<mosaic_0001>
module attributes {stable_mosaic.version = 11 : i64} {
  func.func @_qkv_kernel(%arg0: i32, %arg1: i32, %arg2: i32, %arg3: memref<1x8x32xbf16, #tpu.memory_space<vmem>>, %arg4: memref<1x32x8xbf16, #tpu.memory_space<vmem>>, %arg5: memref<1x1x8xf32, #tpu.memory_space<vmem>>, %arg6: memref<1x32x8xbf16, #tpu.memory_space<vmem>>, %arg7: memref<1x1x8xf32, #tpu.memory_space<vmem>>, %arg8: memref<1x32x8xbf16, #tpu.memory_space<vmem>>, %arg9: memref<1x1x8xf32, #tpu.memory_space<vmem>>, %arg10: memref<1x1x8x8xbf16, #tpu.memory_space<vmem>>, %arg11: memref<1x1x8x8xbf16, #tpu.memory_space<vmem>>, %arg12: memref<1x1x8x8xbf16, #tpu.memory_space<vmem>>) attributes {dimension_semantics = [#tpu.dimension_semantics<parallel>, #tpu.dimension_semantics<parallel>, #tpu.dimension_semantics<arbitrary>], iteration_bounds = array<i64: 2, 1, 4>, scalar_prefetch = 0 : i64, scratch_operands = 0 : i64, tpu.core_type = #tpu.core_type<tc>, window_params = [{transform_indices = @transform_0, window_bounds = array<i64: 1, 8, 32>}, {transform_indices = @transform_1, window_bounds = array<i64: 1, 32, 8>}, {transform_indices = @transform_2, window_bounds = array<i64: 1, 1, 8>}, {transform_indices = @transform_3, window_bounds = array<i64: 1, 32, 8>}, {transform_indices = @transform_4, window_bounds = array<i64: 1, 1, 8>}, {transform_indices = @transform_5, window_bounds = array<i64: 1, 32, 8>}, {transform_indices = @transform_6, window_bounds = array<i64: 1, 1, 8>}, {transform_indices = @transform_7, window_bounds = array<i64: 1, 1, 8, 8>}, {transform_indices = @transform_8, window_bounds = array<i64: 1, 1, 8, 8>}, {transform_indices = @transform_9, window_bounds = array<i64: 1, 1, 8, 8>}]} {
    %c0 = arith.constant 0 : index
    %c0_0 = arith.constant 0 : index
    %c0_1 = arith.constant 0 : index
    %0 = vector.load %arg3[%c0, %c0_0, %c0_1] : memref<1x8x32xbf16, #tpu.memory_space<vmem>>, vector<1x8x32xbf16>
    %1 = vector.shape_cast %0 : vector<1x8x32xbf16> to vector<8x32xbf16>
    %c0_2 = arith.constant 0 : index
    %c0_3 = arith.constant 0 : index
    %c0_4 = arith.constant 0 : index
    %2 = vector.load %arg4[%c0_2, %c0_3, %c0_4] : memref<1x32x8xbf16, #tpu.memory_space<vmem>>, vector<1x32x8xbf16>
    %3 = vector.shape_cast %2 : vector<1x32x8xbf16> to vector<32x8xbf16>
    %cst = arith.constant dense<0.000000e+00> : vector<8x8xf32>
    %4 = tpu.matmul %1, %3, %cst {dimension_numbers = #tpu.dot_dimension_numbers<[1], [0], [0], [1], [0, 0, 1, 1], [], []>} : vector<8x32xbf16>, vector<32x8xbf16>, vector<8x8xf32> -> vector<8x8xf32>
    %c0_5 = arith.constant 0 : index
    %c0_6 = arith.constant 0 : index
    %c0_7 = arith.constant 0 : index
    %5 = vector.load %arg5[%c0_5, %c0_6, %c0_7] : memref<1x1x8xf32, #tpu.memory_space<vmem>>, vector<1x1x8xf32>
    %6 = vector.shape_cast %5 : vector<1x1x8xf32> to vector<1x8xf32>
    %7 = vector.broadcast %6 : vector<1x8xf32> to vector<8x8xf32>
    %8 = arith.addf %4, %7 : vector<8x8xf32>
    %9 = arith.truncf %8 : vector<8x8xf32> to vector<8x8xbf16>
    %c0_8 = arith.constant 0 : index
    %c0_9 = arith.constant 0 : index
    %c0_10 = arith.constant 0 : index
    %c0_11 = arith.constant 0 : index
    %10 = vector.load %arg10[%c0_8, %c0_9, %c0_10, %c0_11] : memref<1x1x8x8xbf16, #tpu.memory_space<vmem>>, vector<1x1x8x8xbf16>
    %11 = vector.shape_cast %10 : vector<1x1x8x8xbf16> to vector<8x8xbf16>
    %12 = vector.shape_cast %9 : vector<8x8xbf16> to vector<1x1x8x8xbf16>
    tpu.vector_store %arg10[%c0_8, %c0_9, %c0_10, %c0_11], %12 {strides = array<i32>} : memref<1x1x8x8xbf16, #tpu.memory_space<vmem>>, vector<1x1x8x8xbf16>,
    %c0_12 = arith.constant 0 : index
    %c0_13 = arith.constant 0 : index
    %c0_14 = arith.constant 0 : index
    %13 = vector.load %arg6[%c0_12, %c0_13, %c0_14] : memref<1x32x8xbf16, #tpu.memory_space<vmem>>, vector<1x32x8xbf16>
    %14 = vector.shape_cast %13 : vector<1x32x8xbf16> to vector<32x8xbf16>
    %cst_15 = arith.constant dense<0.000000e+00> : vector<8x8xf32>
    %15 = tpu.matmul %1, %14, %cst_15 {dimension_numbers = #tpu.dot_dimension_numbers<[1], [0], [0], [1], [0, 0, 1, 1], [], []>} : vector<8x32xbf16>, vector<32x8xbf16>, vector<8x8xf32> -> vector<8x8xf32>
    %c0_16 = arith.constant 0 : index
    %c0_17 = arith.constant 0 : index
    %c0_18 = arith.constant 0 : index
    %16 = vector.load %arg7[%c0_16, %c0_17, %c0_18] : memref<1x1x8xf32, #tpu.memory_space<vmem>>, vector<1x1x8xf32>
    %17 = vector.shape_cast %16 : vector<1x1x8xf32> to vector<1x8xf32>
    %18 = vector.broadcast %17 : vector<1x8xf32> to vector<8x8xf32>
    %19 = arith.addf %15, %18 : vector<8x8xf32>
    %20 = arith.truncf %19 : vector<8x8xf32> to vector<8x8xbf16>
    %c0_19 = arith.constant 0 : index
    %c0_20 = arith.constant 0 : index
    %c0_21 = arith.constant 0 : index
    %c0_22 = arith.constant 0 : index
    %21 = vector.load %arg11[%c0_19, %c0_20, %c0_21, %c0_22] : memref<1x1x8x8xbf16, #tpu.memory_space<vmem>>, vector<1x1x8x8xbf16>
    %22 = vector.shape_cast %21 : vector<1x1x8x8xbf16> to vector<8x8xbf16>
    %23 = vector.shape_cast %20 : vector<8x8xbf16> to vector<1x1x8x8xbf16>
    tpu.vector_store %arg11[%c0_19, %c0_20, %c0_21, %c0_22], %23 {strides = array<i32>} : memref<1x1x8x8xbf16, #tpu.memory_space<vmem>>, vector<1x1x8x8xbf16>,
    %c0_23 = arith.constant 0 : index
    %c0_24 = arith.constant 0 : index
    %c0_25 = arith.constant 0 : index
    %24 = vector.load %arg8[%c0_23, %c0_24, %c0_25] : memref<1x32x8xbf16, #tpu.memory_space<vmem>>, vector<1x32x8xbf16>
    %25 = vector.shape_cast %24 : vector<1x32x8xbf16> to vector<32x8xbf16>
    %cst_26 = arith.constant dense<0.000000e+00> : vector<8x8xf32>
    %26 = tpu.matmul %1, %25, %cst_26 {dimension_numbers = #tpu.dot_dimension_numbers<[1], [0], [0], [1], [0, 0, 1, 1], [], []>} : vector<8x32xbf16>, vector<32x8xbf16>, vector<8x8xf32> -> vector<8x8xf32>
    %c0_27 = arith.constant 0 : index
    %c0_28 = arith.constant 0 : index
    %c0_29 = arith.constant 0 : index
    %27 = vector.load %arg9[%c0_27, %c0_28, %c0_29] : memref<1x1x8xf32, #tpu.memory_space<vmem>>, vector<1x1x8xf32>
    %28 = vector.shape_cast %27 : vector<1x1x8xf32> to vector<1x8xf32>
    %29 = vector.broadcast %28 : vector<1x8xf32> to vector<8x8xf32>
    %30 = arith.addf %26, %29 : vector<8x8xf32>
    %31 = arith.truncf %30 : vector<8x8xf32> to vector<8x8xbf16>
    %c0_30 = arith.constant 0 : index
    %c0_31 = arith.constant 0 : index
    %c0_32 = arith.constant 0 : index
    %c0_33 = arith.constant 0 : index
    %32 = vector.load %arg12[%c0_30, %c0_31, %c0_32, %c0_33] : memref<1x1x8x8xbf16, #tpu.memory_space<vmem>>, vector<1x1x8x8xbf16>
    %33 = vector.shape_cast %32 : vector<1x1x8x8xbf16> to vector<8x8xbf16>
    %34 = vector.shape_cast %31 : vector<8x8xbf16> to vector<1x1x8x8xbf16>
    tpu.vector_store %arg12[%c0_30, %c0_31, %c0_32, %c0_33], %34 {strides = array<i32>} : memref<1x1x8x8xbf16, #tpu.memory_space<vmem>>, vector<1x1x8x8xbf16>,
    return
  }
  func.func @transform_0(%arg0: i32, %arg1: i32, %arg2: i32) -> (i32, i32, i32) {
    %c0_i32 = arith.constant 0 : i32
    %c0_i32_0 = arith.constant 0 : i32
    return %arg0, %arg1, %c0_i32 : i32, i32, i32
  }
  func.func @transform_1(%arg0: i32, %arg1: i32, %arg2: i32) -> (i32, i32, i32) {
    %c0_i32 = arith.constant 0 : i32
    %c0_i32_0 = arith.constant 0 : i32
    %c0_i32_1 = arith.constant 0 : i32
    return %arg2, %c0_i32, %c0_i32_0 : i32, i32, i32
  }
  func.func @transform_2(%arg0: i32, %arg1: i32, %arg2: i32) -> (i32, i32, i32) {
    %c0_i32 = arith.constant 0 : i32
    %c0_i32_0 = arith.constant 0 : i32
    %c0_i32_1 = arith.constant 0 : i32
    return %arg2, %c0_i32, %c0_i32_0 : i32, i32, i32
  }
  func.func @transform_3(%arg0: i32, %arg1: i32, %arg2: i32) -> (i32, i32, i32) {
    %c0_i32 = arith.constant 0 : i32
    %c0_i32_0 = arith.constant 0 : i32
    %c0_i32_1 = arith.constant 0 : i32
    return %arg2, %c0_i32, %c0_i32_0 : i32, i32, i32
  }
  func.func @transform_4(%arg0: i32, %arg1: i32, %arg2: i32) -> (i32, i32, i32) {
    %c0_i32 = arith.constant 0 : i32
    %c0_i32_0 = arith.constant 0 : i32
    %c0_i32_1 = arith.constant 0 : i32
    return %arg2, %c0_i32, %c0_i32_0 : i32, i32, i32
  }
  func.func @transform_5(%arg0: i32, %arg1: i32, %arg2: i32) -> (i32, i32, i32) {
    %c0_i32 = arith.constant 0 : i32
    %c0_i32_0 = arith.constant 0 : i32
    %c0_i32_1 = arith.constant 0 : i32
    return %arg2, %c0_i32, %c0_i32_0 : i32, i32, i32
  }
  func.func @transform_6(%arg0: i32, %arg1: i32, %arg2: i32) -> (i32, i32, i32) {
    %c0_i32 = arith.constant 0 : i32
    %c0_i32_0 = arith.constant 0 : i32
    %c0_i32_1 = arith.constant 0 : i32
    return %arg2, %c0_i32, %c0_i32_0 : i32, i32, i32
  }
  func.func @transform_7(%arg0: i32, %arg1: i32, %arg2: i32) -> (i32, i32, i32, i32) {
    %c0_i32 = arith.constant 0 : i32
    %c0_i32_0 = arith.constant 0 : i32
    return %arg0, %arg2, %arg1, %c0_i32 : i32, i32, i32, i32
  }
  func.func @transform_8(%arg0: i32, %arg1: i32, %arg2: i32) -> (i32, i32, i32, i32) {
    %c0_i32 = arith.constant 0 : i32
    %c0_i32_0 = arith.constant 0 : i32
    return %arg0, %arg2, %arg1, %c0_i32 : i32, i32, i32, i32
  }
  func.func @transform_9(%arg0: i32, %arg1: i32, %arg2: i32) -> (i32, i32, i32, i32) {
    %c0_i32 = arith.constant 0 : i32
    %c0_i32_0 = arith.constant 0 : i32
    return %arg0, %arg2, %arg1, %c0_i32 : i32, i32, i32, i32
  }
}

</mosaic_0001>

<bundles_post_ra>
// kernel: tpu_custom_call.1
= control target key start
LH: loop header
LB: loop body
LE: loop exit
PB: predicated region body
PF: predicated region fallthrough
CT: control target
= control target key end

     0   :  { %s1464_s0 = inlined_call_operand.vmem [shape: bf16[2,8,32], index: 0, kind: input, shape index: {}]   ;;  %s1465_s1 = inlined_call_operand.vmem [shape: bf16[4,32,8], index: 1, kind: input, shape index: {}]   ;;  %s1466_s2 = inlined_call_operand.vmem [shape: f32[4,1,8], index: 2, kind: input, shape index: {}]   ;;  %s1467_s3 = inlined_call_operand.vmem [shape: bf16[4,32,8], index: 3, kind: input, shape index: {}]   ;;  %s1468_s4 = inlined_call_operand.vmem [shape: f32[4,1,8], index: 4, kind: input, shape index: {}]   ;;  %s1469_s5 = inlined_call_operand.vmem [shape: bf16[4,32,8], index: 5, kind: input, shape index: {}]   ;;  %s1470_s6 = inlined_call_operand.vmem [shape: f32[4,1,8], index: 6, kind: input, shape index: {}]   ;;  %s1471_s7 = inlined_call_operand.hbm [shape: bf16[2,4,8,8], index: 7, kind: output, shape index: {0}]   ;;  %s1472_s8 = inlined_call_operand.hbm [shape: bf16[2,4,8,8], index: 8, kind: output, shape index: {1}]   ;;  %s1473_s9 = inlined_call_operand.hbm [shape: bf16[2,4,8,8], index: 9, kind: output, shape index: {2}]  }
   0x1   :  { %1484 = sst [smem:[#allocation17_spill]] %s1464_s0 }
   0x2   :  { %15 = vsyncpa [#allocation3], 0 }
   0x3   :  { %17 = vsyncpa [#allocation3 + $0x1], 0 }
   0x4   :  { %18 = vsyncpa [#allocation5], 0 }
   0x5   :  { %20 = vsyncpa [#allocation5 + $0x1], 0  ;;  %s1228_s30 = smov 0   ;;  %s1230_s10 = smov 0  }
   0x6   :  { %s1232_s11 = smov 0   ;;  %s1234_s12 = smov 0  }
   0x7   :  { %s1236_s13 = smov 0   ;;  %s1238_s14 = smov 0  }
   0x8   :  { %s1240_s15 = smov 0   ;;  %s1242_s16 = smov 0  }
   0x9 LB: > { %1485 = sst [smem:[#allocation9_spill]] %s1148_s30  ;;  %s1475_s17 = sadd.s32 4294967295, %s1176_s16   ;;  %s1176_s16 = sphi %s1242_s16, %s26_s16   ;;  %s1172_s15 = sphi %s1240_s15, %s1506_s15   ;;  %s1168_s14 = sphi %s1238_s14, %s1505_s14   ;;  %s1164_s13 = sphi %s1236_s13, %s1510_s13   ;;  %s1160_s12 = sphi %s1234_s12, %s1503_s12   ;;  %s1156_s11 = sphi %s1232_s11, %s1509_s11   ;;  %s1152_s10 = sphi %s1230_s10, %s1508_s10   ;;  %s1148_s30 = sphi %s1228_s30, %s1507_s30  }
   0xa   : > { %1486 = sst [smem:[#allocation10_spill]] %s1156_s11  ;;  %s1474_s18 = sadd.s32 4294967294, %s1176_s16  }
   0xb   : > { %1487 = sst [smem:[#allocation11_spill]] %s1168_s14  ;;  %s38_s19 = sadd.s32 1, %s1168_s14 }
   0xc   : > { %1488 = sst [smem:[#allocation12_spill]] %s1172_s15  ;;  %p39_p0 = scmp.ge.s32.totalorder %s38_s19, 4 }
   0xd   : > { %s45_s20 = sadd.s32 1, %s1172_s15  ;;  %p250_p1 = scmp.ne.s32.totalorder %s1156_s11, %s1152_s10 }
   0xe   : > { %p251_p2 = scmp.eq.s32.totalorder %s1475_s17, 7  ;;  %s1512_s19 = smov (%p39_p0, %s38_s19), 0 }
   0xf   : > { %1489 = sst [smem:[#allocation13_spill]] %s1512_s19  ;;  %s1514_s20 = smov (!%p39_p0, %s45_s20), %s1172_s15 }
  0x10   : > { %s234_s21 = ssub.s32 %s1168_s14, %s1512_s19  ;;  %p1281_p3 = por %p251_p2, %p250_p1 }
  0x11   : > { %p47_p4 = scmp.ge.s32.totalorder %s1514_s20, 2  ;;  %p256_p5 = scmp.ne.s32.totalorder %s1152_s10, %s1148_s30 }
  0x12   : > { %p257_p6 = scmp.eq.s32.totalorder %s1474_s18, 7  ;;  %p880_p7 = scmp.ge.s32.totalorder %s1176_s16, 1 }
  0x13   : > { %s1516_s20 = smov (%p47_p4, %s1514_s20), 0  ;;  %p387_p9 = scmp.lt.s32.totalorder %s1176_s16, 9 }
  0x14   : > { %1491 = sst [smem:[#allocation14_spill]] %s1516_s20  ;;  %p1292_p8 = por %p257_p6, %p256_p5 }
  0x15   : > { %s233_s24 = ssub.s32 %s1172_s15, %s1516_s20  ;;  %s240_s25 = sadd.s32 1, %s1156_s11 }
  0x16   : > { %s1492_s23 = scalar_select %p1292_p8, 1, 0 }
  0x17   : > { %s235_s26 = sor.u32 %s234_s21, %s233_s24  ;;  %p388_p10 = pnand %p880_p7, %p387_p9 }
  0x18   : > { %1493 = sst [smem:[#allocation15_spill]] %s1492_s23  ;;  %p238_p11 = scmp.eq.s32.totalorder %s235_s26, 0 }
  0x19   : > { %391 = sbr.rel (%p388_p10) target bundleno = 200 (0xc8), region = 48  ;;  %p466_p12 = scmp.lt.s32.totalorder (!%p388_p10), %s1160_s12, 3 }
  0x1a   : > { %s1301_s27 = scalar_select %p238_p11, %s1156_s11, %s240_s25  }
  0x1b   : > { %p459_p13 = scmp.lt.s32.totalorder (!%p388_p10), %s1164_s13, 1  ;;  %s1495_s0 = sld [smem:[#allocation17_spill]] (!%p388_p10) }
  0x1c   : > { %1494 = sst [smem:[#allocation16_spill]] %s1301_s27  ;;  %s1042_s15 = scalar_lea.hbm (!%p388_p10), %s1472_s8, 32 }
  0x1e   : > { %s1306_s28 = scalar_select %p466_p12, %s1160_s12, 3  ;;  %vm512_vm0 = vcmask 261120   ;;  %vm530_vm1 = vcmask 60416  }
  0x1f   : > { %s460_s29 = scalar_select %p459_p13, %s1164_s13, 1 }
  0x20   : > { %s929_s18 = sshll.u32 %s1306_s28, 4  ;;  %s473_s21 = scalar_lea.vmem %s1466_s2, %s1306_s28 }
  0x21   : > { %s470_s26 = scalar_lea.vmem %s1465_s1, %s929_s18  ;;  %s478_s14 = scalar_lea.vmem %s1467_s3, %s929_s18  ;;  %v1019_v7 = vld [vmem:[%s473_s21] ss:$0 sm:$0xff] }
  0x22   : > { %v933_v0 = vld [vmem:[%s470_s26 + $0x8] sm:$0xff]  ;;  %s486_s23 = scalar_lea.vmem %s1469_s5, %s929_s18  ;;  %s884_s30 = sshll.u32 %s460_s29, 2  ;;  %v932_v3 = vld [vmem:[%s470_s26] sm:$0xff] }
  0x23   : > { %v935_v1 = vld [vmem:[%s478_s14 + $0x8] sm:$0xff]  ;;  %522 = vmatpush.bf16.msra.mxu0 %v933_v0  ;;  %v934_v4 = vld [vmem:[%s478_s14] sm:$0xff]  ;;  %s465_s19 = scalar_lea.vmem %s1495_s0, %s884_s30  ;;  %s481_s14 = scalar_lea.vmem %s1468_s4, %s1306_s28 }
  0x24   : > { %v937_v2 = vld [vmem:[%s486_s23 + $0x8] sm:$0xff]  ;;  %558 = vmatpush.bf16.msra.mxu1 %v935_v1  ;;  %v936_v5 = vld [vmem:[%s486_s23] sm:$0xff]  ;;  %s489_s27 = scalar_lea.vmem %s1470_s6, %s1306_s28  ;;  %s921_s29 = sshll.u32 %s1164_s13, 2 }
  0x25   : > { %593 = vmatpush.bf16.msra.mxu2 %v937_v2  ;;  %v491_v6 = vld [vmem:[%s465_s19] sm:$0xf]  ;;  %s1483_s30 = sand.u32 1, %s1152_s10   ;;  %s624_s24 = sadd.s32 %s1160_s12, %s921_s29 }
  0x26   : > { %s1339_s25 = sshll.u32 %s1483_s30, 2  ;;  %s922_s26 = sshll.u32 %s624_s24, 2  ;;  %v1020_v8 = vld [vmem:[%s481_s14] ss:$0 sm:$0xff] }
  0x27   : > { %523 = vmatpush.bf16.msra.mxu0 %v932_v3  ;;  %s1496_s19 = sadd.s32 4294967295, %s1176_s16   ;;  %s643_s12 = scalar_lea.hbm %s1472_s8, %s922_s26  ;;  %v1021_v15 = vld [vmem:[%s489_s27] ss:$0 sm:$0xff] }
  0x28   : > { %559 = vmatpush.bf16.msra.mxu1 %v934_v4  ;;  %s1348_s11 = sand.u32 1, %s1496_s19   ;;  %s626_s29 = scalar_lea.hbm %s1471_s7, %s922_s26 }
  0x29   : > { %594 = vmatpush.bf16.msra.mxu2 %v936_v5  ;;  %s451_s30 = scalar_lea.vmem [#allocation4], %s1339_s25  ;;  %s1359_s28 = sshll.u32 %s643_s12, 4  ;;  %s648_s28 = int_to_ptr.hbm [resolvable:$true] %s1359_s28 }
  0x2a   : > { %899 = vmatmul.msk.bf16.vlgmr.msra.gmra.mxu0 %vm512_vm0, %v491_v6  ;;  %s1357_s0 = sshll.u32 %s451_s30, 4  ;;  %s444_s21 = scalar_lea.vmem [#allocation2], %s1339_s25  ;;  %s646_s0 = int_to_ptr.vmem [resolvable:$true] %s1357_s0 }
  0x2b   : > { %908 = vmatmul.msk.bf16.vlgmr.msra.gmra.mxu1 %vm512_vm0, %v491_v6  ;;  %s1364_s14 = sshll.u32 %s444_s21, 4  ;;  %s1366_s24 = sshll.u32 %s626_s29, 4  ;;  %s629_s14 = int_to_ptr.vmem [resolvable:$true] %s1364_s14  ;;  %s631_s24 = int_to_ptr.hbm [resolvable:$true] %s1366_s24 }
  0x2c   : > { %917 = vmatmul.msk.bf16.vlgmr.msra.gmra.mxu2 %vm512_vm0, %v491_v6  ;;  %s660_s19 = scalar_lea.hbm %s1473_s9, %s922_s26  ;;  %s458_s18 = scalar_lea.vmem [#allocation6], %s1339_s25 }
  0x2d   : > { %s1379_s13 = sshll.u32 %s458_s18, 4  ;;  %s1381_s12 = sshll.u32 %s660_s19, 4  ;;  %s663_s13 = int_to_ptr.vmem [resolvable:$true] %s1379_s13  ;;  %s665_s12 = int_to_ptr.hbm [resolvable:$true] %s1381_s12 }
  0x2e   : > { %s608_s20 = scalar_lea.sflag [#allocation5], %s1348_s11  ;;  %s1036_s23 = sshra.s32 %s648_s28, 4  ;;  %s1037_s23 = int_to_ptr.hbm [resolvable:$true] %s1036_s23 }
  0x2f   : > { %s1038_s29 = scalar_lea.hbm %s1037_s23, 4  ;;  %p1043_p4 = scmp.lt.s32.totalorder %s1037_s23, %s1472_s8 }
  0x30   : > { %p1039_p0 = scmp.ne.s32.totalorder %s1037_s23, %s1038_s29  ;;  %p1044_p5 = scmp.lt.s32.totalorder %s1042_s15, %s1038_s29 }
  0x32   : > { %p1040_p1 = pnand %p1039_p0, %p1281_p3  ;;  %p1045_p6 = por %p1044_p5, %p1043_p4 }
  0x34   : > { %p1041_p2 = pneg %p1040_p1 }
  0x36   : > { %p1046_p7 = pnand %p1045_p6, %p1041_p2 }
  0xa7   : > { %v525_v9 = vpop.f32.mrf.mxu0 }
  0xa8   : > { %v561_v10 = vpop.f32.mrf.mxu1  ;;  %v526_v11 = vadd.f32 %v1019_v7, %v525_v9 }
  0xa9   : > { %v562_v12 = vadd.f32 %v1020_v8, %v561_v10 }
  0xaa   : > { %v529_v13 = vpack.c.bf16 %v526_v11, %v526_v11 }
  0xab   : > { %v565_v14 = vpack.c.bf16 %v562_v12, %v562_v12 }
  0xad   : > { %566 = vst.msk [vmem:[%s451_s30] sm:$0xf] %vm530_vm1, %v565_v14 }
  0xae   : > { %1049 = shalt.err (!%p1046_p7)
}
  0xaf   : > { %939 = dma.vmem_to_hbm [thread:$0]  (%p1281_p3), %s646_s0, 64, %s648_s28, %s608_s20   ;;  %531 = vst.msk [vmem:[%s444_s21] sm:$0xf] %vm530_vm1, %v529_v13  ;;  %v596_v16 = vpop.f32.mrf.mxu2 }
  0xb0   : > { %s1497_s19 = sand.u32 1, %s1152_s10   ;;  %s1064_s23 = sshra.s32 %s631_s24, 4  ;;  %s1065_s23 = int_to_ptr.hbm [resolvable:$true] %s1064_s23 }
  0xb1   : > { %s603_s26 = scalar_lea.sflag [#allocation3], %s1497_s19  ;;  %s1066_s29 = scalar_lea.hbm %s1065_s23, 4 }
  0xb2   : > { %p1067_p9 = scmp.ne.s32.totalorder %s1065_s23, %s1066_s29  ;;  %s1070_s17 = scalar_lea.hbm %s1471_s7, 32 }
  0xb3   : > { %p1071_p12 = scmp.lt.s32.totalorder %s1065_s23, %s1471_s7  ;;  %p1072_p13 = scmp.lt.s32.totalorder %s1070_s17, %s1066_s29 }
  0xb4   : > { %p1068_p10 = pnand %p1067_p9, %p1281_p3 }
  0xb5   : > { %p1073_p0 = por %p1072_p13, %p1071_p12 }
  0xb6   : > { %p1069_p11 = pneg %p1068_p10 }
  0xb8   : > { %p1074_p1 = pnand %p1073_p0, %p1069_p11 }
  0xba   : > { %1077 = shalt.err (!%p1074_p1)
}
  0xbb   : > { %938 = dma.vmem_to_hbm [thread:$0]  (%p1281_p3), %s629_s14, 64, %s631_s24, %s603_s26   ;;  %v597_v17 = vadd.f32 %v1021_v15, %v596_v16  ;;  %v527_v18 = vpop.f32.mrf.mxu0  ;;  %v563_v19 = vpop.f32.mrf.mxu1 }
  0xbc   : > { %s1092_s28 = sshra.s32 %s665_s12, 4  ;;  %s1098_s14 = scalar_lea.hbm %s1473_s9, 32  ;;  %s1093_s28 = int_to_ptr.hbm [resolvable:$true] %s1092_s28 }
  0xbd   : > { %v600_v20 = vpack.c.bf16 %v597_v17, %v597_v17  ;;  %s1094_s21 = scalar_lea.hbm %s1093_s28, 4  ;;  %p1099_p6 = scmp.lt.s32.totalorder %s1093_s28, %s1473_s9 }
  0xbe   : > { %p1095_p2 = scmp.ne.s32.totalorder %s1093_s28, %s1094_s21  ;;  %p1100_p7 = scmp.lt.s32.totalorder %s1098_s14, %s1094_s21 }
  0xbf   : > { %601 = vst.msk [vmem:[%s458_s18] sm:$0xf] %vm530_vm1, %v600_v20 }
  0xc0   : > { %p1096_p4 = pnand %p1095_p2, %p1281_p3  ;;  %p1101_p9 = por %p1100_p7, %p1099_p6 }
  0xc2   : > { %p1097_p5 = pneg %p1096_p4 }
  0xc4   : > { %p1102_p10 = pnand %p1101_p9, %p1097_p5 }
  0xc6   : > { %1105 = shalt.err (!%p1102_p10)
}
  0xc7   : > { %940 = dma.vmem_to_hbm [thread:$0]  (%p1281_p3), %s663_s13, 64, %s665_s12, %s608_s20   ;;  %v598_v21 = vpop.f32.mrf.mxu2 }
  0xc8 PF: > { %s1498_s25 = sld [smem:[#allocation9_spill]]  ;;  %p954_p11 = scmp.ge.s32.totalorder %s1176_s16, 2 }
  0xca   : > { %p945_p12 = pnand %p954_p11, %p1292_p8 }
  0xcc   : > { %p946_p13 = pneg %p945_p12 }
  0xce   : > { %s676_s29 = sand.u32 1, %s1498_s25  }
  0xcf   : > { %s677_s27 = scalar_lea.sflag [#allocation3], %s676_s29 }
  0xd0   : > { %1139 = dma.done.wait (%p946_p13), %s677_s27, 64  }
  0xd1   : > { %1141 = vsyncadd (%p946_p13), %s677_s27, 4294967232  ;;  %s1500_s15 = sadd.s32 4294967294, %s1176_s16  }
  0xd2   : > { %s686_s17 = sand.u32 1, %s1500_s15  }
  0xd3   : > { %s687_s22 = scalar_lea.sflag [#allocation5], %s686_s17 }
  0xd4   : > { %1143 = dma.done.wait (%p946_p13), %s687_s22, 128  }
  0xd5   : > { %1145 = vsyncadd (%p946_p13), %s687_s22, 4294967168  ;;  %s26_s16 = sadd.s32 1, %s1176_s16   ;;  %s1501_s11 = sld [smem:[#allocation10_spill]] }
  0xd6   : > { %p23_p3 = scmp.ge.s32.totalorder %s26_s16, 10   ;;  %s1502_s13 = sld [smem:[#allocation16_spill]] }
  0xd7   : > { %s1503_s12 = sld [smem:[#allocation11_spill]]  ;;  %s1507_s30 = smov %s1152_s10 }
  0xd8   : > { %s1504_s20 = sld [smem:[#allocation12_spill]] }
  0xd9   : > { %s1505_s14 = sld [smem:[#allocation13_spill]] }
  0xda   : > { %s1506_s15 = sld [smem:[#allocation14_spill]]  ;;  %25 = sbr.rel (!%p23_p3) target bundleno = 9 (0x9), region = 133 }
  0xdb   : > { %s1508_s10 = smov %s1501_s11 }
  0xdc   : > { %s1509_s11 = smov %s1502_s13 }
  0xde   : > { %s1510_s13 = smov %s1504_s20 }
  0xdf   :  { %703 = vsyncpa [#allocation3], 1 }
  0xe0   :  { %705 = vsyncpa [#allocation3 + $0x1], 1 }
  0xe1   :  { %706 = vsyncpa [#allocation5], 1 }
  0xe2   :  { %708 = vsyncpa [#allocation5 + $0x1], 1 }

</bundles_post_ra>
